<compile_context>
chip_gen: v7x
topology: tpu7x:2x2x1
jax: 0.10.0
libtpu: 0.0.40
codegen_flags: <defaults>
</compile_context>

<pallas_src>
import jax
import jax.numpy as jnp
from jax.experimental import pallas as pl
from jax.experimental.pallas import tpu as pltpu


def _critic_kernel(x_ref, w_ref, b_ref, o_ref):
    # x_ref: (TB, E) f32 activation tile (streamed / double-buffered)
    # w_ref: (1, E)  f32 lane-dense weight row (resident across grid steps)
    # b_ref: (1,)    f32 bias scalar in SMEM
    # o_ref: (TB, 1) f32 output tile
    x = x_ref[...]
    w = w_ref[...]
    b = b_ref[0]
    # Row-dot as broadcast-multiply + lane-sum: VPU + XLU work, which is free
    # under an HBM-read-bound roofline, and avoids an N=1 MXU matmul.
    v = jnp.sum(x * w, axis=-1, keepdims=True) + b
    o_ref[...] = v.astype(o_ref.dtype)


def critic_forward(s_emb, weight, bias, *, tile_b=None,
                   vmem_limit_bytes=32 * 1024 * 1024):
    """s_emb: (B, E) f32; weight: (1, E) f32; bias: (1,) f32 -> (B, 1) f32."""
    B, E = s_emb.shape
    assert weight.shape == (1, E), "weight must be stored lane-dense as (1, E)"
    bias = jnp.asarray(bias, dtype=jnp.float32).reshape((1,))

    if tile_b is None:
        # Keep 2 (double-buffer) * TB * E * 4B of activation tiles <= ~16 MiB
        # so the same tile size is safe on v7x (64 MiB VMEM); cap at 1024 rows.
        max_tb = max(8, (16 * 1024 * 1024) // (2 * E * 4))
        tile_b = min(1024, max_tb)
    # TB must be a multiple of 8 (sublane tiling) and need not exceed the
    # batch rounded up to a multiple of 8.
    tile_b = max(8, (int(tile_b) // 8) * 8)
    tile_b = min(tile_b, max(8, ((B + 7) // 8) * 8))

    grid_b = pl.cdiv(B, tile_b)
    b_pad = grid_b * tile_b
    x = s_emb
    if b_pad != B:
        x = jnp.pad(s_emb, ((0, b_pad - B), (0, 0)))

    out = pl.pallas_call(
        _critic_kernel,
        out_shape=jax.ShapeDtypeStruct((b_pad, 1), jnp.float32),
        grid_spec=pltpu.PrefetchScalarGridSpec(
            num_scalar_prefetch=0,
            grid=(grid_b,),
            in_specs=[
                # streamed activation tiles
                pl.BlockSpec((tile_b, E), lambda i: (i, 0)),
                # lane-dense weight row, constant block index -> resident
                pl.BlockSpec((1, E), lambda i: (0, 0)),
                # scalar bias lives in SMEM (no padded VMEM tile, no DMA stream)
                pl.BlockSpec(memory_space=pltpu.MemorySpace.SMEM),
            ],
            out_specs=pl.BlockSpec((tile_b, 1), lambda i: (i, 0)),
        ),
        compiler_params=pltpu.CompilerParams(
            dimension_semantics=("parallel",),
            vmem_limit_bytes=vmem_limit_bytes,
        ),
    )(x, weight, bias)

    return out[:B] if b_pad != B else out


def init_critic_params(key, emb_dim):
    """Deterministic 'orthogonal' init for a (1, emb_dim) linear weight.

    For a single-row matrix, orthogonal init with gain=1 reduces to a random
    unit-norm row vector; bias is zero (per initialize_weights). The weight is
    stored lane-dense as (1, E).
    """
    w = jax.random.normal(key, (1, emb_dim), dtype=jnp.float32)
    w = w / jnp.linalg.norm(w)
    bias = jnp.zeros((1,), dtype=jnp.float32)
    return w, bias


if __name__ == "__main__":
    emb_dim = 512     # module default
    batch = 60        # deliberately not a multiple of the tile (tests padding)

    key = jax.random.PRNGKey(0)
    k_w, k_x = jax.random.split(key)

    weight, bias = init_critic_params(k_w, emb_dim)
    s_emb = jax.random.normal(k_x, (batch, emb_dim), dtype=jnp.float32)

    # Small tile so the demo exercises a multi-step pipelined grid (4 tiles).
    v = critic_forward(s_emb, weight, bias, tile_b=16)
    jax.block_until_ready(v)

    # Reference check in plain JAX (same math as torch.nn.Linear).
    v_ref = s_emb @ weight.T + bias
    assert v.shape == (batch, 1)
    assert jnp.allclose(v, v_ref, atol=1e-5, rtol=1e-5)

    print("KERNEL_OK")
</pallas_src>

<mosaic_0001>
module attributes {stable_mosaic.version = 11 : i64} {
  func.func @_critic_kernel(%arg0: i32, %arg1: memref<16x512xf32, #tpu.memory_space<vmem>>, %arg2: memref<1x512xf32, #tpu.memory_space<vmem>>, %arg3: memref<1xf32, #tpu.memory_space<smem>>, %arg4: memref<16x1xf32, #tpu.memory_space<vmem>>) attributes {dimension_semantics = [#tpu.dimension_semantics<parallel>], iteration_bounds = array<i64: 4>, scalar_prefetch = 0 : i64, scratch_operands = 0 : i64, tpu.core_type = #tpu.core_type<tc>, window_params = [{transform_indices = @transform_0, window_bounds = array<i64: 16, 512>}, {pipeline_mode = #tpu.pipeline_mode<synchronous>, transform_indices = @transform_1, window_bounds = array<i64: 1, 512>}, {transform_indices = @transform_2, window_bounds = array<i64: 1>}, {transform_indices = @transform_3, window_bounds = array<i64: 16, 1>}]} {
    %c0 = arith.constant 0 : index
    %c0_0 = arith.constant 0 : index
    %0 = vector.load %arg1[%c0, %c0_0] : memref<16x512xf32, #tpu.memory_space<vmem>>, vector<16x512xf32>
    %c0_1 = arith.constant 0 : index
    %c0_2 = arith.constant 0 : index
    %1 = vector.load %arg2[%c0_1, %c0_2] : memref<1x512xf32, #tpu.memory_space<vmem>>, vector<1x512xf32>
    %c0_3 = arith.constant 0 : index
    %2 = memref.load %arg3[%c0_3] : memref<1xf32, #tpu.memory_space<smem>>
    %3 = vector.broadcast %1 : vector<1x512xf32> to vector<16x512xf32>
    %4 = arith.mulf %0, %3 : vector<16x512xf32>
    %cst = arith.constant dense<0.000000e+00> : vector<16xf32>
    %5 = vector.multi_reduction <add>, %4, %cst [1] : vector<16x512xf32> to vector<16xf32>
    %6 = vector.shape_cast %5 : vector<16xf32> to vector<16x1xf32>
    %7 = vector.broadcast %2 : f32 to vector<16x1xf32>
    %8 = arith.addf %6, %7 : vector<16x1xf32>
    %c0_4 = arith.constant 0 : index
    %c0_5 = arith.constant 0 : index
    %9 = vector.load %arg4[%c0_4, %c0_5] : memref<16x1xf32, #tpu.memory_space<vmem>>, vector<16x1xf32>
    tpu.vector_store %arg4[%c0_4, %c0_5], %8 {strides = array<i32>} : memref<16x1xf32, #tpu.memory_space<vmem>>, vector<16x1xf32>,
    return
  }
  func.func @transform_0(%arg0: i32) -> (i32, i32) {
    %c0_i32 = arith.constant 0 : i32
    %c0_i32_0 = arith.constant 0 : i32
    return %arg0, %c0_i32 : i32, i32
  }
  func.func @transform_1(%arg0: i32) -> (i32, i32) {
    %c0_i32 = arith.constant 0 : i32
    %c0_i32_0 = arith.constant 0 : i32
    %c0_i32_1 = arith.constant 0 : i32
    return %c0_i32, %c0_i32_0 : i32, i32
  }
  func.func @transform_2(%arg0: i32) -> i32 {
    %c0_i32 = arith.constant 0 : i32
    %c0_i32_0 = arith.constant 0 : i32
    return %c0_i32 : i32
  }
  func.func @transform_3(%arg0: i32) -> (i32, i32) {
    %c0_i32 = arith.constant 0 : i32
    %c0_i32_0 = arith.constant 0 : i32
    return %arg0, %c0_i32 : i32, i32
  }
}

</mosaic_0001>

<bundles_post_ra>
// kernel: tpu_custom_call.1
= control target key start
LH: loop header
LB: loop body
LE: loop exit
PB: predicated region body
PF: predicated region fallthrough
CT: control target
= control target key end

     0   :  { %s576_s0 = inlined_call_operand.hbm [shape: f32[64,512], index: 0, kind: input, shape index: {}]   ;;  %s577_s1 = inlined_call_operand.vmem [shape: f32[1,512], index: 1, kind: input, shape index: {}]   ;;  %s578_s2 = inlined_call_operand.<no memory space> [shape: f32[1], index: 2, kind: input, shape index: {}]   ;;  %s579_s3 = inlined_call_operand.vmem [shape: f32[64,1], index: 3, kind: output, shape index: {}]  }
   0x1   :  { %8 = sst [smem:[#allocation2]] %s578_s2 }
   0x2   :  { %9 = vsyncpa [#allocation4], 0 }
   0x3   :  { %11 = vsyncpa [#allocation4 + $0x1], 0  ;;  %s466_s14 = smov 0   ;;  %s468_s15 = smov 0  }
   0x4   :  { %s470_s16 = smov 0   ;;  %s472_s17 = smov 0  }
   0x5 LB: > { %s317_s2 = sadd.s32 4294967295, %s438_s17   ;;  %s486_s18 = sadd.s32 1, %s438_s17   ;;  %s438_s17 = sphi %s472_s17, %s586_s17   ;;  %s434_s16 = sphi %s470_s16, %s585_s16   ;;  %s430_s15 = sphi %s468_s15, %s584_s15   ;;  %s426_s14 = sphi %s466_s14, %s583_s14  }
   0x6   : > { %s21_s19 = ssub.s32 %s438_s17, %s486_s18  ;;  %s24_s20 = sadd.s32 1, %s434_s16 }
   0x7   : > { %p22_p0 = scmp.eq.s32.totalorder %s21_s19, 0  ;;  %p31_p1 = scmp.ne.s32.totalorder %s434_s16, %s430_s15 }
   0x8   : > { %p32_p2 = scmp.eq.s32.totalorder %s438_s17, 0  ;;  %p37_p3 = scmp.ne.s32.totalorder %s430_s15, %s426_s14 }
   0x9   : > { %s496_s21 = scalar_select %p22_p0, %s434_s16, %s24_s20  }
   0xa   : > { %p33_p4 = por %p32_p2, %p31_p1  ;;  %p38_p5 = scmp.eq.s32.totalorder %s317_s2, 0 }
   0xb   : > { %p339_p6 = scmp.lt.s32.totalorder %s438_s17, 4  ;;  %s135_s23 = sand.u32 1, %s434_s16  }
   0xc   : > { %p501_p7 = por %p38_p5, %p37_p3  ;;  %s321_s24 = sshll.u32 %s135_s23, 6 }
   0xd   : > { %s332_s25 = sshll.u32 %s438_s17, 10  ;;  %s139_s29 = scalar_lea.vmem [#allocation3], %s321_s24 }
   0xe   : > { %s510_s28 = scalar_lea.hbm %s576_s0, %s332_s25  ;;  %s147_s30 = sshll.u32 %s139_s29, 4  ;;  %s512_s30 = int_to_ptr.vmem [resolvable:$true] %s147_s30 }
   0xf   : > { %p514_p8 = pnand %p339_p6, %p33_p4  ;;  %s519_s5 = scalar_lea.sflag [#allocation4], %s135_s23 }
  0x10   : > { %s374_s6 = scalar_lea.hbm %s510_s28, 1024  ;;  %s379_s9 = scalar_lea.hbm %s576_s0, 4096 }
  0x11   : > { %p375_p10 = scmp.ne.s32.totalorder %s510_s28, %s374_s6  ;;  %p376_p11 = pneg %p514_p8 }
  0x12   : > { %p380_p0 = scmp.lt.u32.totalorder %s510_s28, %s576_s0  ;;  %p381_p1 = scmp.lt.u32.totalorder %s379_s9, %s374_s6 }
  0x13   : > { %p377_p12 = pnand %p376_p11, %p375_p10  ;;  %p383_p3 = scmp.lt.u32.totalorder %s374_s6, %s510_s28 }
  0x14   : > { %p382_p2 = por %p381_p1, %p380_p0 }
  0x15   : > { %p378_p13 = pneg %p377_p12 }
  0x16   : > { %p384_p4 = por %p383_p3, %p382_p2 }
  0x18   : > { %p385_p5 = pnand %p384_p4, %p378_p13 }
  0x1a   : > { %388 = shalt.err (!%p385_p5)
}
  0x1b   : > { %s389_s12 = scalar_lea.vmem %s512_s30, 1024  ;;  %s440_s13 = smov [#allocation3]  }
  0x1c   : > { %p390_p6 = scmp.ne.s32.totalorder %s512_s30, %s389_s12  ;;  %s394_s14 = sshll.u32 %s440_s13, 4  ;;  %s395_s14 = int_to_ptr.vmem [resolvable:$false] %s394_s14 }
  0x1d   : > { %s396_s19 = scalar_lea.vmem %s395_s14, 2048  ;;  %p397_p9 = scmp.lt.s32.totalorder %s512_s30, %s395_s14 }
  0x1e   : > { %p392_p10 = pnand %p390_p6, %p376_p11  ;;  %p398_p0 = scmp.lt.s32.totalorder %s396_s19, %s389_s12 }
  0x20   : > { %p393_p12 = pneg %p392_p10  ;;  %p399_p1 = por %p398_p0, %p397_p9 }
  0x22   : > { %p400_p2 = pnand %p399_p1, %p393_p12 }
  0x24   : > { %403 = shalt.err (!%p400_p2)
}
  0x25   : > { %s441_s20 = smov 512   ;;  %s442_s23 = smov 32  }
  0x26   : > { %338 = dma.hbm_to_vmem [thread:$0]  (!%p514_p8), %s510_s28, 1024, %s512_s30, %s519_s5, %s441_s20, %s441_s20, %s442_s23  }
  0x27   : > { %p155_p11 = scmp.lt.s32.totalorder %s438_s17, 5  ;;  %p582_p13 = scmp.ge.s32.totalorder %s438_s17, 1 }
  0x29   : > { %p156_p3 = pnand %p582_p13, %p155_p11 }
  0x2a   : > { %s161_s24 = sand.u32 (!%p156_p3), 1, %s430_s15  }
  0x2b   : > { %159 = sbr.rel (%p156_p3) target bundleno = 216 (0xd8), region = 32  ;;  %s326_s25 = sshll.u32 (!%p156_p3), %s161_s24, 6 }
  0x2c   : > { %s162_s26 = scalar_lea.sflag (!%p156_p3), [#allocation4], %s161_s24  ;;  %s165_s27 = scalar_lea.vmem (!%p156_p3), [#allocation3], %s326_s25 }
  0x32   : > { %421 = dma.done.wait (%p501_p7), %s162_s26, 1024  }
  0x33   : > { %423 = vsyncadd (%p501_p7), %s162_s26, 4294966272  ;;  %v206_v0 = vlaneseq  ;;  %v195_v6 = vld [vmem:[%s165_s27] sm:$0xff]  ;;  %v196_v7 = vld [vmem:[%s165_s27 + $0x8] sm:$0xff]  ;;  %s327_s22 = sshll.u32 %s317_s2, 1  ;;  %s204_s30 = sld [smem:[#allocation2]]  ;;  %vm247_vm0 = vcmask 7168  }
  0x34   : > { %v197_v8 = vld [vmem:[%s165_s27 + $0x10] sm:$0xff]  ;;  %v203_v9 = vld [vmem:[%s577_s1] sm:$0xf]  ;;  %v200_v15 = vld [vmem:[%s165_s27 + $0x28] sm:$0xff]  ;;  %p190_p7 = scmp.lt.s32.totalorder %s327_s22, 7 }
  0x35   : > { %v207_v1 = vshrl.u32 %v206_v0, 7  ;;  %v199_v14 = vld [vmem:[%s165_s27 + $0x20] sm:$0xff]  ;;  %v201_v16 = vld [vmem:[%s165_s27 + $0x30] sm:$0xff]  ;;  %v198_v17 = vld [vmem:[%s165_s27 + $0x18] sm:$0xff] }
  0x36   : > { %v202_v21 = vld [vmem:[%s165_s27 + $0x38] sm:$0xff]  ;;  %s588_s22 = smov (!%p190_p7, %s327_s22), 7 }
  0x37   : > { %v208_v2 = vsub.s32 0, %v207_v1  ;;  %v212_v3 = vsub.s32 1, %v207_v1  ;;  %v216_v4 = vsub.s32 2, %v207_v1  ;;  %v220_v5 = vsub.s32 3, %v207_v1  ;;  %s328_s4 = sshll.u32 %s588_s22, 3 }
  0x38   : > { %s193_s7 = scalar_lea.vmem %s579_s3, %s328_s4 }
  0x39   : > { %v209_v10 = vrot.slane %v203_v9, %v208_v2  ;;  %v213_v11 = vrot.slane %v203_v9, %v212_v3  ;;  %v217_v12 = vrot.slane %v203_v9, %v216_v4  ;;  %v221_v13 = vrot.slane %v203_v9, %v220_v5 }
  0x3a   : > { %v244_v33 = vstv %s204_s30 }
  0x3b   : > { %v226_v18 = vmul.f32 %v209_v10, %v195_v6  ;;  %v227_v19 = vmul.f32 %v213_v11, %v196_v7  ;;  %v228_v20 = vmul.f32 %v217_v12, %v197_v8  ;;  %v230_v22 = vmul.f32 %v209_v10, %v199_v14 }
  0x3c   : > { %v231_v23 = vmul.f32 %v213_v11, %v200_v15  ;;  %v232_v24 = vmul.f32 %v217_v12, %v201_v16  ;;  %v229_v25 = vmul.f32 %v221_v13, %v198_v17  ;;  %v233_v29 = vmul.f32 %v221_v13, %v202_v21 }
  0x3d   : > { %v234_v26 = vadd.f32 %v227_v19, %v226_v18 }
  0x3e   : > { %v239_v27 = vadd.f32 %v231_v23, %v230_v22 }
  0x3f   : > { %v235_v28 = vadd.f32 %v234_v26, %v228_v20 }
  0x40   : > { %v240_v30 = vadd.f32 %v239_v27, %v232_v24 }
  0x41   : > { %v236_v31 = vadd.f32 %v235_v28, %v229_v25 }
  0x42   : > { %v241_v32 = vadd.f32 %v240_v30, %v233_v29 }
  0x43   : > { %237 = vadd.xlane.f32.xlu0 %v236_v31 }
  0x47   : > { %242 = vadd.xlane.f32.xlu0 %v241_v32 }
  0xd0   : > { %v238_v34 = vpop.xlane.xlu0 %237 }
  0xd1   : > { %v245_v35 = vadd.f32 %v244_v33, %v238_v34 }
  0xd3   : > { %248 = vst.msk [vmem:[%s193_s7] sm:$0xff] %vm247_vm0, %v245_v35 }
  0xd4   : > { %v243_v36 = vpop.xlane.xlu0 %242 }
  0xd5   : > { %v246_v37 = vadd.f32 %v244_v33, %v243_v36 }
  0xd7   : > { %249 = vst.msk [vmem:[%s193_s7 + $0x8] sm:$0xff] %vm247_vm0, %v246_v37 }
  0xd8 PF: > { %p14_p8 = scmp.ge.s32.totalorder %s486_s18, 6   ;;  %s583_s14 = smov %s430_s15 }
  0xd9   : > { %s584_s15 = smov %s434_s16  ;;  %s585_s16 = smov %s496_s21 }
  0xda   : > { %s586_s17 = smov %s486_s18  ;;  %16 = sbr.rel (!%p14_p8) target bundleno = 5 (0x5), region = 72 }
  0xe1   :  { %272 = vsyncpa [#allocation4], 1 }
  0xe2   :  { %274 = vsyncpa [#allocation4 + $0x1], 1 }

</bundles_post_ra>
